<compile_context>
chip_gen: v7x
topology: tpu7x:2x2x1
jax: 0.10.0
libtpu: 0.0.40
codegen_flags: <defaults>
</compile_context>

<pallas_src>
import functools

import jax
import jax.numpy as jnp
from jax.experimental import pallas as pl
from jax.experimental.pallas import tpu as pltpu


_VMEM_TILE_BUDGET = 32 * 1024 * 1024      # per-step tile budget (safe on v7x 64 MiB VMEM)
_VMEM_LIMIT_BYTES = 48 * 1024 * 1024      # explicit scoped-VMEM limit (> 16/32 MiB defaults)
_MAX_RESIDENT_W_BYTES = 8 * 1024 * 1024   # beyond this, tile the class axis


def _round_up(x: int, m: int) -> int:
    return ((x + m - 1) // m) * m


def _cdiv(a: int, b: int) -> int:
    return -(-a // b)


def _linear_kernel(x_ref, wt_ref, b_ref, o_ref):
    # x_ref : (tn, d)   row tile of node embeddings
    # wt_ref: (d, tc)   classifier weight, pre-transposed; tc % 128 == 0 (lane-dense)
    # b_ref : (1, tc)   classifier bias tile
    # o_ref : (tn, tc)  logits tile (lane-dense -> unmasked stores)
    acc = jnp.dot(x_ref[...], wt_ref[...], preferred_element_type=jnp.float32)
    o_ref[...] = (acc + b_ref[...].astype(jnp.float32)).astype(o_ref.dtype)


@functools.partial(
    jax.jit, static_argnames=("block_rows", "min_pallas_rows", "compute_dtype")
)
def node_prediction_head(input_nodes, weight, bias, *,
                         block_rows: int = 1024,
                         min_pallas_rows: int = 128,
                         compute_dtype=None):
    """logits = input_nodes @ weight.T + bias  (PyTorch nn.Linear semantics).

    input_nodes: (..., embedding_dim)
    weight:      (num_classes, embedding_dim)
    bias:        (num_classes,)
    returns:     (..., num_classes)
    """
    *lead, d = input_nodes.shape
    c = weight.shape[0]
    out_dtype = input_nodes.dtype
    x2d = input_nodes.reshape(-1, d)
    n = x2d.shape[0]

    # Tiny problem: a pallas_call is pure launch/step overhead vs one XLA dot.
    if n < min_pallas_rows:
        out = x2d @ weight.T + bias
        return out.reshape(*lead, c)

    # ---- optional low-precision compute path (bf16 MXU on v6e/v7x) --------
    cdt = jnp.dtype(compute_dtype) if compute_dtype is not None else jnp.dtype(out_dtype)
    if x2d.dtype != cdt:
        x2d = x2d.astype(cdt)
    w = weight.astype(cdt) if weight.dtype != cdt else weight

    in_itemsize = cdt.itemsize
    out_itemsize = jnp.dtype(out_dtype).itemsize
    sub = max(8, 32 // in_itemsize)           # dtype-aware sublane multiple

    # ---- class tiling: lane-dense, resident-W capped at ~8 MiB ------------
    c_pad = _round_up(c, 128)
    tc = c_pad
    if d * tc * in_itemsize > _MAX_RESIDENT_W_BYTES:
        tc = max(128, (_MAX_RESIDENT_W_BYTES // (d * in_itemsize)) // 128 * 128)
    c_pad = _round_up(c_pad, tc)              # every class block full -> unmasked vst
    grid_c = c_pad // tc
    w_resident = grid_c == 1

    # ---- row tile from explicit VMEM budget --------------------------------
    w_bufs = 1 if w_resident else 2
    fixed = w_bufs * d * tc * in_itemsize + 2 * tc * 4            # W (+ bias) tiles
    per_row = 2 * d * in_itemsize + 2 * tc * out_itemsize         # X + out, double-buffered
    avail = max(_VMEM_TILE_BUDGET - fixed, 0)
    tn_cap = max(sub, (avail // per_row) // sub * sub)
    tn = min(_round_up(block_rows, sub), tn_cap, _round_up(n, sub))
    if n > sub:  # keep >= 2 row steps: pipelining + megacore sharding on v7x
        tn = min(tn, _round_up(_cdiv(n, 2), sub))
    tn = max(tn, sub)
    grid_r = _cdiv(n, tn)                     # ragged last block: Pallas masks it

    # One-time pre-transpose + class pad of the (small) weight: (c, d) -> (d, c_pad).
    w_t = jnp.pad(w, ((0, c_pad - c), (0, 0))).T          # lane-dense minor dim c_pad
    b_p = jnp.pad(bias, (0, c_pad - c)).reshape(1, c_pad)

    if w_resident:
        # Constant index_map -> double-buffering buys nothing; halve VMEM footprint.
        w_spec = pl.BlockSpec((d, tc), lambda i, j: (0, j), pipeline_mode=pl.Buffered(1))
        b_spec = pl.BlockSpec((1, tc), lambda i, j: (0, j), pipeline_mode=pl.Buffered(1))
    else:
        w_spec = pl.BlockSpec((d, tc), lambda i, j: (0, j))
        b_spec = pl.BlockSpec((1, tc), lambda i, j: (0, j))

    cost = pl.CostEstimate(
        flops=2 * n * d * c_pad,
        transcendentals=0,
        bytes_accessed=(n * d + c_pad * d) * in_itemsize
        + c_pad * 4
        + n * c_pad * out_itemsize,
    )

    out = pl.pallas_call(
        _linear_kernel,
        out_shape=jax.ShapeDtypeStruct((n, c_pad), out_dtype),
        grid=(grid_r, grid_c),
        in_specs=[
            pl.BlockSpec((tn, d), lambda i, j: (i, 0)),   # X: streamed over rows
            w_spec,                                        # W^T: resident or class-tiled
            b_spec,                                        # bias
        ],
        out_specs=pl.BlockSpec((tn, tc), lambda i, j: (i, j)),
        compiler_params=pltpu.CompilerParams(
            dimension_semantics=("parallel", "parallel"),
            vmem_limit_bytes=_VMEM_LIMIT_BYTES,
        ),
        cost_estimate=cost,
    )(x2d, w_t, b_p)

    return out[:, :c].reshape(*lead, c)


if __name__ == "__main__":
    # Small shapes: batch=2, num_nodes=8, embedding_dim=32, num_classes=8
    batch, num_nodes, embedding_dim, num_classes = 2, 8, 32, 8

    key = jax.random.PRNGKey(0)
    k_x, k_w, k_b = jax.random.split(key, 3)

    input_nodes = jax.random.normal(
        k_x, (batch, num_nodes, embedding_dim), dtype=jnp.float32
    )
    # Deterministic parameter init (shapes match nn.Linear(embedding_dim, num_classes)).
    bound = 1.0 / (embedding_dim ** 0.5)
    weight = jax.random.uniform(
        k_w, (num_classes, embedding_dim), minval=-bound, maxval=bound,
        dtype=jnp.float32,
    )
    bias = jax.random.uniform(
        k_b, (num_classes,), minval=-bound, maxval=bound, dtype=jnp.float32
    )

    ref = input_nodes @ weight.T + bias

    # 1) Force the Pallas path (f32) at these tiny demo shapes so the kernel runs.
    logits = jax.block_until_ready(
        node_prediction_head(input_nodes, weight, bias, min_pallas_rows=0)
    )
    assert logits.shape == (batch, num_nodes, num_classes)
    assert jnp.allclose(logits, ref, atol=1e-5, rtol=1e-5)

    # 2) bf16 fast path (v6e/v7x recommendation): f32 accumulation, looser tolerance.
    logits_bf16 = jax.block_until_ready(
        node_prediction_head(
            input_nodes, weight, bias, min_pallas_rows=0, compute_dtype=jnp.bfloat16
        )
    )
    assert logits_bf16.shape == (batch, num_nodes, num_classes)
    assert jnp.allclose(logits_bf16, ref, atol=5e-2, rtol=5e-2)

    # 3) Default dispatch (falls back to plain XLA at this tiny row count).
    logits_small = jax.block_until_ready(
        node_prediction_head(input_nodes, weight, bias)
    )
    assert jnp.allclose(logits_small, ref, atol=1e-5, rtol=1e-5)

    print("KERNEL_OK")
</pallas_src>

<mosaic_0001>
module attributes {stable_mosaic.version = 11 : i64} {
  func.func @_linear_kernel(%arg0: i32, %arg1: i32, %arg2: memref<8x32xf32, #tpu.memory_space<vmem>>, %arg3: memref<32x128xf32, #tpu.memory_space<vmem>>, %arg4: memref<1x128xf32, #tpu.memory_space<vmem>>, %arg5: memref<8x128xf32, #tpu.memory_space<vmem>>) attributes {dimension_semantics = [#tpu.dimension_semantics<parallel>, #tpu.dimension_semantics<parallel>], iteration_bounds = array<i64: 2, 1>, scalar_prefetch = 0 : i64, scratch_operands = 0 : i64, tpu.core_type = #tpu.core_type<tc>, window_params = [{transform_indices = @transform_0, window_bounds = array<i64: 8, 32>}, {pipeline_mode = #tpu.pipeline_mode<synchronous>, transform_indices = @transform_1, window_bounds = array<i64: 32, 128>}, {pipeline_mode = #tpu.pipeline_mode<synchronous>, transform_indices = @transform_2, window_bounds = array<i64: 1, 128>}, {transform_indices = @transform_3, window_bounds = array<i64: 8, 128>}]} {
    %c0 = arith.constant 0 : index
    %c0_0 = arith.constant 0 : index
    %0 = vector.load %arg2[%c0, %c0_0] : memref<8x32xf32, #tpu.memory_space<vmem>>, vector<8x32xf32>
    %c0_1 = arith.constant 0 : index
    %c0_2 = arith.constant 0 : index
    %1 = vector.load %arg3[%c0_1, %c0_2] : memref<32x128xf32, #tpu.memory_space<vmem>>, vector<32x128xf32>
    %cst = arith.constant dense<0.000000e+00> : vector<8x128xf32>
    %2 = tpu.matmul %0, %1, %cst {dimension_numbers = #tpu.dot_dimension_numbers<[1], [0], [0], [1], [0, 0, 1, 1], [], []>} : vector<8x32xf32>, vector<32x128xf32>, vector<8x128xf32> -> vector<8x128xf32>
    %c0_3 = arith.constant 0 : index
    %c0_4 = arith.constant 0 : index
    %3 = vector.load %arg4[%c0_3, %c0_4] : memref<1x128xf32, #tpu.memory_space<vmem>>, vector<1x128xf32>
    %4 = vector.broadcast %3 : vector<1x128xf32> to vector<8x128xf32>
    %5 = arith.addf %2, %4 : vector<8x128xf32>
    %c0_5 = arith.constant 0 : index
    %c0_6 = arith.constant 0 : index
    %6 = vector.load %arg5[%c0_5, %c0_6] : memref<8x128xf32, #tpu.memory_space<vmem>>, vector<8x128xf32>
    tpu.vector_store %arg5[%c0_5, %c0_6], %5 {strides = array<i32>} : memref<8x128xf32, #tpu.memory_space<vmem>>, vector<8x128xf32>,
    return
  }
  func.func @transform_0(%arg0: i32, %arg1: i32) -> (i32, i32) {
    %c0_i32 = arith.constant 0 : i32
    %c0_i32_0 = arith.constant 0 : i32
    return %arg0, %c0_i32 : i32, i32
  }
  func.func @transform_1(%arg0: i32, %arg1: i32) -> (i32, i32) {
    %c0_i32 = arith.constant 0 : i32
    %c0_i32_0 = arith.constant 0 : i32
    return %c0_i32, %arg1 : i32, i32
  }
  func.func @transform_2(%arg0: i32, %arg1: i32) -> (i32, i32) {
    %c0_i32 = arith.constant 0 : i32
    %c0_i32_0 = arith.constant 0 : i32
    return %c0_i32, %arg1 : i32, i32
  }
  func.func @transform_3(%arg0: i32, %arg1: i32) -> (i32, i32) {
    %c0_i32 = arith.constant 0 : i32
    return %arg0, %arg1 : i32, i32
  }
}

</mosaic_0001>

<bundles_post_ra>
// kernel: node_prediction_head.1
= control target key start
LH: loop header
LB: loop body
LE: loop exit
PB: predicated region body
PF: predicated region fallthrough
CT: control target
= control target key end

     0   :  { %s512_s12 = smov 0   ;;  %s514_s13 = smov 0   ;;  %s560_s0 = inlined_call_operand.vmem [shape: f32[16,32], index: 0, kind: input, shape index: {}]   ;;  %s561_s1 = inlined_call_operand.vmem [shape: f32[32,128], index: 1, kind: input, shape index: {}]   ;;  %s562_s2 = inlined_call_operand.vmem [shape: f32[1,128], index: 2, kind: input, shape index: {}]   ;;  %s563_s3 = inlined_call_operand.vmem [shape: f32[16,128], index: 3, kind: output, shape index: {}]  }
   0x1   :  { %s516_s14 = smov 0  }
   0x2 LB: > { %s25_s15 = sadd.s32 1, %s483_s13  ;;  %p409_p0 = scmp.ge.s32.totalorder %s487_s14, 1  ;;  %s487_s14 = sphi %s516_s14, %s13_s14   ;;  %s483_s13 = sphi %s514_s13, %s565_s13   ;;  %s479_s12 = sphi %s512_s12, %s564_s12  }
   0x3   : > { %p27_p1 = scmp.ge.s32.totalorder %s25_s15, 2  ;;  %p167_p2 = scmp.lt.s32.totalorder %s487_s14, 3 }
   0x5   : > { %s567_s15 = smov (%p27_p1, %s25_s15), 0  ;;  %p168_p3 = pnand %p409_p0, %p167_p2 }
   0x6   : > { %v218_v0 = vld [vmem:[%s561_s1] sm:$0xff] (!%p168_p3)  ;;  %v219_v1 = vld [vmem:[%s561_s1 + $0x8] sm:$0xff] (!%p168_p3)  ;;  %v220_v2 = vld [vmem:[%s561_s1 + $0x10] sm:$0xff] (!%p168_p3)  ;;  %v489_v3 = vmov (!%p168_p3), 0.0|0.0   ;;  %vm490_vm0 = vmmov (!%p168_p3), 0   ;;  %v491_v6 = vmov (!%p168_p3), 0.0  }
   0x7   : > { %171 = sbr.rel (%p168_p3) target bundleno = 233 (0xe9), region = 32  ;;  %432 = vmatprep.subr.bf16.mxu0 (!%p168_p3), %v489_v3  ;;  %v433_v4 = vpack.c.bf16 (!%p168_p3), %v219_v1, %v218_v0  ;;  %v221_v5 = vld [vmem:[%s561_s1 + $0x18] sm:$0xff] (!%p168_p3)  ;;  %429 = vmatprep.mubr.msk.f32.mxu0 (!%p168_p3), %vm490_vm0, %v491_v6  ;;  %p199_p4 = scmp.lt.s32.totalorder (!%p168_p3), %s479_s12, 1  ;;  %vm229_vm1 = vcmask (!%p168_p3), 261120   ;;  %v412_v9 = vld [vmem:[%s562_s2] ss:$0 sm:$0xff] (!%p168_p3) }
   0x8   : > { %v436_v7 = vpack.c.bf16 (!%p168_p3), %v221_v5, %v220_v2 }
   0x9   : > { %434 = vmatpush3.bf16.msra.mxu0 (!%p168_p3), %v433_v4 }
   0xa   : > { %435 = vmatprep.subr.bf16.mxu0 (!%p168_p3), %v489_v3 }
   0xd   : > { %437 = vmatpush3.bf16.msra.mxu0 (!%p168_p3), %v436_v7 }
   0xe   : > { %s569_s12 = smov (!%p199_p4, %s479_s12), 1 }
   0xf   : > { %s410_s24 = sshll.u32 %s569_s12, 3 }
  0x10   : > { %s202_s27 = scalar_lea.vmem %s560_s0, %s410_s24  ;;  %s216_s5 = scalar_lea.vmem %s563_s3, %s410_s24 }
  0x11   : > { %v217_v8 = vld [vmem:[%s202_s27] sm:$0xff] }
  0x12   : > { %430 = vmatmul.mubr.msk.f32.vlgmr.msra.gmra.mrb[0].mxu0 %vm229_vm1, %v217_v8 }
  0xe5   : > { %v299_v10 = vpop.f32.mrb[0].mxu0 }
  0xe6   : > { %v300_v11 = vadd.f32 %v412_v9, %v299_v10  ;;  %v431_v12 = vpop.f32.mrb[1].mxu0 }
  0xe8   : > { %303 = vst [vmem:[%s216_s5] sm:$0xff] %v300_v11 }
  0xe9 PF: > { %s13_s14 = sadd.s32 1, %s487_s14   ;;  %s564_s12 = smov %s483_s13 }
  0xea   : > { %p10_p5 = scmp.ge.s32.totalorder %s13_s14, 4   ;;  %s565_s13 = smov %s567_s15 }
  0xec   :  { %12 = sbr.rel (!%p10_p5) target bundleno = 2 (0x2), region = 68 }

</bundles_post_ra>
